<compile_context>
chip_gen: v7x
topology: tpu7x:2x2x1
jax: 0.10.0
libtpu: 0.0.40
codegen_flags: <defaults>
</compile_context>

<pallas_src>
import functools

import jax
import jax.numpy as jnp
from jax import lax
from jax.experimental import pallas as pl
from jax.experimental.pallas import tpu as pltpu


# ------------------------------ fused kernel ------------------------------- #

def _shufflev2_residual_kernel(x_ref, w1_ref, b1_ref, wdw_ref, bdw_ref,
                               w2_ref, b2_ref, o_ref, *, cr, width):
    """pw1(+BN+ReLU) -> dw3x3(+BN) -> pw2(+BN+ReLU) on the collapsed layout.

    x_ref:   (B, H, W*cr)    f32   residual half, lane index = w*cr + c
    w1_ref:  (W*cr, W*cr)    bf16  block-diagonal folded 1x1 conv #1
    b1_ref:  (1, W*cr)       f32   lane-tiled bias
    wdw_ref: (9, W*cr)       f32   lane-tiled depthwise taps, row = dy*3 + dx
    bdw_ref: (1, W*cr)       f32
    w2_ref:  (W*cr, W*cr)    bf16  block-diagonal folded 1x1 conv #2
    b2_ref:  (1, W*cr)       f32
    o_ref:   (B, H, W*cr)    f32   processed residual (lane-dense store)
    """
    B, H, wcr = x_ref.shape
    bh = B * H

    x = x_ref[...]

    # ---- 1x1 conv + folded BN + ReLU: one lane-dense MXU matmul ----
    r = jnp.dot(x.reshape(bh, wcr).astype(jnp.bfloat16), w1_ref[...],
                preferred_element_type=jnp.float32)
    r = jnp.maximum(r + b1_ref[...], 0.0).reshape(B, H, wcr)

    # ---- depthwise 3x3 + folded BN: all in vregs (no scratch) ----
    # dy (row) shifts: zero-row concat + static slices (per-batch, so the
    # H boundary never leaks across batch elements).
    zrow = jnp.zeros((B, 1, wcr), jnp.float32)
    rows = (jnp.concatenate([zrow, r[:, :H - 1, :]], axis=1),   # r[h-1]
            r,                                                  # r[h]
            jnp.concatenate([r[:, 1:, :], zrow], axis=1))       # r[h+1]

    # dx (column) shifts: lane roll by +/-cr (XLU) plus a W-boundary lane mask.
    lane = lax.broadcasted_iota(jnp.int32, (1, 1, wcr), 2)
    ok_m1 = lane >= cr                  # reading column w-1 is in bounds
    ok_p1 = lane < (width - 1) * cr     # reading column w+1 is in bounds

    taps = wdw_ref[...]                                         # (9, W*cr)
    acc = jnp.broadcast_to(bdw_ref[...].reshape(1, 1, wcr), (B, H, wcr))
    for dy in range(3):
        base = rows[dy]
        for dx in range(3):
            d = dx - 1
            if d == 0:
                shifted = base
            else:
                # out[l] = base[l + d*cr]  (shift whole W axis by d columns)
                rolled = pltpu.roll(base, shift=(-d * cr) % wcr, axis=2)
                shifted = jnp.where(ok_m1 if d < 0 else ok_p1, rolled, 0.0)
            k = dy * 3 + dx
            acc = acc + shifted * taps[k:k + 1].reshape(1, 1, wcr)

    # ---- 1x1 conv + folded BN + ReLU: second lane-dense MXU matmul ----
    y = jnp.dot(acc.reshape(bh, wcr).astype(jnp.bfloat16), w2_ref[...],
                preferred_element_type=jnp.float32)
    y = jnp.maximum(y + b2_ref[...], 0.0)

    o_ref[...] = y.reshape(B, H, wcr)   # full 128-lane unmasked store


# ---------------------- parameter init + BN folding ------------------------ #

def _bn_params(key, c):
    k1, k2, k3, k4 = jax.random.split(key, 4)
    gamma = 1.0 + 0.1 * jax.random.normal(k1, (c,), jnp.float32)
    beta = 0.1 * jax.random.normal(k2, (c,), jnp.float32)
    mean = 0.1 * jax.random.normal(k3, (c,), jnp.float32)
    var = 1.0 + 0.1 * jax.random.uniform(k4, (c,), jnp.float32)
    return gamma, beta, mean, var


def _fold_affine(bias, gamma, beta, mean, var, eps=1e-5):
    scale = gamma / jnp.sqrt(var + eps)
    return scale, (bias - mean) * scale + beta


def make_params(key, channels, width):
    """Residual-branch params (stride=1, in==out case; acts on channels//2).

    Returns (kernel_params, core_params): kernel_params are the lane-collapsed
    forms fed to the Pallas kernel (block-diagonal 1x1 weights, lane-tiled
    biases/taps); core_params are the small folded forms used by the pure-JAX
    reference.
    """
    c = channels // 2
    keys = jax.random.split(key, 9)

    # conv1: 1x1, c -> c  (PyTorch weight (c_out, c_in, 1, 1), bias (c,))
    w1 = 0.1 * jax.random.normal(keys[0], (c, c), jnp.float32)
    b1 = 0.1 * jax.random.normal(keys[1], (c,), jnp.float32)
    s1, b1f = _fold_affine(b1, *_bn_params(keys[2], c))
    w1f = w1.T * s1[None, :]                               # (Cin, Cout), f32

    # conv_dw: 3x3 depthwise, groups=c (PyTorch weight (c, 1, 3, 3), bias (c,))
    wdw = 0.1 * jax.random.normal(keys[3], (c, 3, 3), jnp.float32)
    bdw = 0.1 * jax.random.normal(keys[4], (c,), jnp.float32)
    sdw, bdwf = _fold_affine(bdw, *_bn_params(keys[5], c))
    wdwf = (wdw * sdw[:, None, None]).reshape(c, 9).T      # (9, c), row=dy*3+dx

    # conv2: 1x1, c -> c
    w2 = 0.1 * jax.random.normal(keys[6], (c, c), jnp.float32)
    b2 = 0.1 * jax.random.normal(keys[7], (c,), jnp.float32)
    s2, b2f = _fold_affine(b2, *_bn_params(keys[8], c))
    w2f = w2.T * s2[None, :]

    eye_w = jnp.eye(width, dtype=jnp.float32)
    kernel_params = dict(
        w1=jnp.kron(eye_w, w1f).astype(jnp.bfloat16),      # (W*c, W*c) bf16
        b1=jnp.tile(b1f.reshape(1, c), (1, width)),        # (1, W*c) f32
        wdw=jnp.tile(wdwf, (1, width)),                    # (9, W*c) f32
        bdw=jnp.tile(bdwf.reshape(1, c), (1, width)),      # (1, W*c) f32
        w2=jnp.kron(eye_w, w2f).astype(jnp.bfloat16),
        b2=jnp.tile(b2f.reshape(1, c), (1, width)),
    )
    core_params = dict(
        w1=w1f.astype(jnp.bfloat16), b1=b1f.reshape(1, c),
        wdw=wdwf, bdw=bdwf.reshape(1, c),
        w2=w2f.astype(jnp.bfloat16), b2=b2f.reshape(1, c),
    )
    return kernel_params, core_params


# ------------------------------ forward pass ------------------------------- #

def shufflev2_cell_forward(s0, s1, drop_prob, params):
    """ShuffleV2Cell.forward (stride=1, in_channels == out_channels).

    s0 and drop_prob are accepted (and unused), exactly like the PyTorch
    module. s1 is NCHW; output is NCHW.
    """
    del s0, drop_prob
    B, C, H, W = s1.shape
    cr = C // 2
    wcr = W * cr

    # channel_split: shortcut half never touches the kernel (identity branch).
    shortcut = s1[:, :cr]                                  # (B, cr, H, W) NCHW
    residual = s1[:, cr:]                                  # (B, cr, H, W)

    # residual half -> lane-collapsed NH(W*cr): only half the tensor is
    # transposed; W*cr = 128 lanes at the test size (lane-dense).
    x = jnp.transpose(residual, (0, 2, 3, 1)).reshape(B, H, wcr)
    x = x.astype(jnp.float32)

    kernel = functools.partial(_shufflev2_residual_kernel, cr=cr, width=W)

    out = pl.pallas_call(
        kernel,
        out_shape=jax.ShapeDtypeStruct((B, H, wcr), jnp.float32),
        grid_spec=pltpu.PrefetchScalarGridSpec(
            num_scalar_prefetch=0,
            grid=(1,),   # batch folded into the block (best on 1-TC v5e/v6e;
                         # for large B on v7x, grid=(B,) + "parallel" instead)
            in_specs=[
                pl.BlockSpec((B, H, wcr), lambda i: (0, 0, 0)),   # x (residual)
                pl.BlockSpec((wcr, wcr), lambda i: (0, 0)),       # w1 block-diag
                pl.BlockSpec((1, wcr), lambda i: (0, 0)),         # b1
                pl.BlockSpec((9, wcr), lambda i: (0, 0)),         # dw taps
                pl.BlockSpec((1, wcr), lambda i: (0, 0)),         # dw bias
                pl.BlockSpec((wcr, wcr), lambda i: (0, 0)),       # w2 block-diag
                pl.BlockSpec((1, wcr), lambda i: (0, 0)),         # b2
            ],
            out_specs=pl.BlockSpec((B, H, wcr), lambda i: (0, 0, 0)),
        ),
        compiler_params=pltpu.CompilerParams(
            dimension_semantics=("arbitrary",),
        ),
    )(x, params["w1"], params["b1"], params["wdw"], params["bdw"],
      params["w2"], params["b2"])

    # back to NCHW, then cat([shortcut, residual]) + channel_shuffle(groups=2)
    # == per-channel interleave, done as one stack/reshape on NCHW.
    res_nchw = jnp.transpose(out.reshape(B, H, W, cr), (0, 3, 1, 2))
    y = jnp.stack([shortcut.astype(res_nchw.dtype), res_nchw], axis=2)
    return y.reshape(B, C, H, W)


# ------------------------- pure-JAX reference check ------------------------ #

def ref_forward(s1, core):
    B, C, H, W = s1.shape
    cr = C // 2
    sc = s1[:, :cr].astype(jnp.float32)                        # NCHW shortcut
    r = jnp.transpose(s1[:, cr:], (0, 2, 3, 1)).astype(jnp.float32)  # NHWC

    r = jnp.maximum(
        jnp.einsum("bhwi,io->bhwo", r.astype(jnp.bfloat16), core["w1"],
                   preferred_element_type=jnp.float32) + core["b1"], 0.0)
    wdw_hwio = core["wdw"].reshape(3, 3, 1, cr)
    r = lax.conv_general_dilated(
        r, wdw_hwio, (1, 1), "SAME",
        dimension_numbers=("NHWC", "HWIO", "NHWC"),
        feature_group_count=cr,
        precision=lax.Precision.HIGHEST) + core["bdw"]
    r = jnp.maximum(
        jnp.einsum("bhwi,io->bhwo", r.astype(jnp.bfloat16), core["w2"],
                   preferred_element_type=jnp.float32) + core["b2"], 0.0)

    r = jnp.transpose(r, (0, 3, 1, 2))                         # NCHW residual
    return jnp.stack([sc, r], axis=2).reshape(B, C, H, W)      # interleave


# ---------------------------------- main ----------------------------------- #

if __name__ == "__main__":
    key = jax.random.PRNGKey(0)
    k_p, k_s0, k_s1 = jax.random.split(key, 3)

    B, C, H, W = 2, 16, 16, 16     # in_channels == out_channels == 16, stride 1
    params, core = make_params(k_p, C, W)
    s0 = jax.random.normal(k_s0, (B, C, H, W), jnp.float32)   # unused, as in torch
    s1 = jax.random.normal(k_s1, (B, C, H, W), jnp.float32)
    drop_prob = 0.0

    out = shufflev2_cell_forward(s0, s1, drop_prob, params)
    out = jax.block_until_ready(out)

    ref = jax.block_until_ready(ref_forward(s1, core))
    assert out.shape == (B, C, H, W)
    # bf16 MXU operands for the 1x1 convs => slightly looser tolerance.
    # TODO(synk): vs a true f32 PyTorch reference the error may be larger.
    assert jnp.allclose(out, ref, rtol=5e-3, atol=5e-3), "mismatch vs JAX reference"

    print("KERNEL_OK")
</pallas_src>

<mosaic_0001>
module attributes {stable_mosaic.version = 11 : i64} {
  func.func @_shufflev2_residual_kernel(%arg0: i32, %arg1: memref<2x16x128xf32, #tpu.memory_space<vmem>>, %arg2: memref<128x128xbf16, #tpu.memory_space<vmem>>, %arg3: memref<1x128xf32, #tpu.memory_space<vmem>>, %arg4: memref<9x128xf32, #tpu.memory_space<vmem>>, %arg5: memref<1x128xf32, #tpu.memory_space<vmem>>, %arg6: memref<128x128xbf16, #tpu.memory_space<vmem>>, %arg7: memref<1x128xf32, #tpu.memory_space<vmem>>, %arg8: memref<2x16x128xf32, #tpu.memory_space<vmem>>) attributes {dimension_semantics = [#tpu.dimension_semantics<arbitrary>], iteration_bounds = array<i64: 1>, scalar_prefetch = 0 : i64, scratch_operands = 0 : i64, tpu.core_type = #tpu.core_type<tc>, window_params = [{pipeline_mode = #tpu.pipeline_mode<synchronous>, transform_indices = @transform_0, window_bounds = array<i64: 2, 16, 128>}, {pipeline_mode = #tpu.pipeline_mode<synchronous>, transform_indices = @transform_1, window_bounds = array<i64: 128, 128>}, {pipeline_mode = #tpu.pipeline_mode<synchronous>, transform_indices = @transform_2, window_bounds = array<i64: 1, 128>}, {pipeline_mode = #tpu.pipeline_mode<synchronous>, transform_indices = @transform_3, window_bounds = array<i64: 9, 128>}, {pipeline_mode = #tpu.pipeline_mode<synchronous>, transform_indices = @transform_4, window_bounds = array<i64: 1, 128>}, {pipeline_mode = #tpu.pipeline_mode<synchronous>, transform_indices = @transform_5, window_bounds = array<i64: 128, 128>}, {pipeline_mode = #tpu.pipeline_mode<synchronous>, transform_indices = @transform_6, window_bounds = array<i64: 1, 128>}, {pipeline_mode = #tpu.pipeline_mode<synchronous>, transform_indices = @transform_7, window_bounds = array<i64: 2, 16, 128>}]} {
    %c0 = arith.constant 0 : index
    %c0_0 = arith.constant 0 : index
    %c0_1 = arith.constant 0 : index
    %0 = vector.load %arg1[%c0, %c0_0, %c0_1] : memref<2x16x128xf32, #tpu.memory_space<vmem>>, vector<2x16x128xf32>
    %1 = vector.shape_cast %0 : vector<2x16x128xf32> to vector<32x128xf32>
    %2 = arith.truncf %1 : vector<32x128xf32> to vector<32x128xbf16>
    %c0_2 = arith.constant 0 : index
    %c0_3 = arith.constant 0 : index
    %3 = vector.load %arg2[%c0_2, %c0_3] : memref<128x128xbf16, #tpu.memory_space<vmem>>, vector<128x128xbf16>
    %cst = arith.constant dense<0.000000e+00> : vector<32x128xf32>
    %4 = tpu.matmul %2, %3, %cst {dimension_numbers = #tpu.dot_dimension_numbers<[1], [0], [0], [1], [0, 0, 1, 1], [], []>} : vector<32x128xbf16>, vector<128x128xbf16>, vector<32x128xf32> -> vector<32x128xf32>
    %c0_4 = arith.constant 0 : index
    %c0_5 = arith.constant 0 : index
    %5 = vector.load %arg3[%c0_4, %c0_5] : memref<1x128xf32, #tpu.memory_space<vmem>>, vector<1x128xf32>
    %6 = vector.broadcast %5 : vector<1x128xf32> to vector<32x128xf32>
    %7 = arith.addf %4, %6 : vector<32x128xf32>
    %cst_6 = arith.constant 0.000000e+00 : f32
    %8 = vector.broadcast %cst_6 : f32 to vector<32x128xf32>
    %9 = arith.maximumf %7, %8 : vector<32x128xf32>
    %10 = vector.shape_cast %9 : vector<32x128xf32> to vector<2x16x128xf32>
    %cst_7 = arith.constant 0.000000e+00 : f32
    %11 = vector.broadcast %cst_7 : f32 to vector<2x1x128xf32>
    %12 = vector.extract_strided_slice %10 {offsets = [0, 0, 0], sizes = [2, 15, 128], strides = [1, 1, 1]} : vector<2x16x128xf32> to vector<2x15x128xf32>
    %13 = tpu.concatenate %11, %12 in 1 : vector<2x1x128xf32>, vector<2x15x128xf32> -> vector<2x16x128xf32>
    %14 = vector.extract_strided_slice %10 {offsets = [0, 1, 0], sizes = [2, 15, 128], strides = [1, 1, 1]} : vector<2x16x128xf32> to vector<2x15x128xf32>
    %15 = tpu.concatenate %14, %11 in 1 : vector<2x15x128xf32>, vector<2x1x128xf32> -> vector<2x16x128xf32>
    %16 = tpu.iota {dimensions = array<i32: 2>} : vector<1x1x128xi32>
    %c8_i32 = arith.constant 8 : i32
    %17 = vector.broadcast %c8_i32 : i32 to vector<1x1x128xi32>
    %18 = arith.cmpi sge, %16, %17 : vector<1x1x128xi32>
    %c120_i32 = arith.constant 120 : i32
    %19 = vector.broadcast %c120_i32 : i32 to vector<1x1x128xi32>
    %20 = arith.cmpi slt, %16, %19 : vector<1x1x128xi32>
    %c0_8 = arith.constant 0 : index
    %c0_9 = arith.constant 0 : index
    %21 = vector.load %arg4[%c0_8, %c0_9] : memref<9x128xf32, #tpu.memory_space<vmem>>, vector<9x128xf32>
    %c0_10 = arith.constant 0 : index
    %c0_11 = arith.constant 0 : index
    %22 = vector.load %arg5[%c0_10, %c0_11] : memref<1x128xf32, #tpu.memory_space<vmem>>, vector<1x128xf32>
    %23 = vector.shape_cast %22 : vector<1x128xf32> to vector<1x1x128xf32>
    %24 = vector.shape_cast %23 : vector<1x1x128xf32> to vector<1x1x128xf32>
    %25 = vector.broadcast %24 : vector<1x1x128xf32> to vector<2x16x128xf32>
    %c8_i32_12 = arith.constant 8 : i32
    %26 = tpu.dynamic_rotate %13 by %c8_i32_12 dim 2 : vector<2x16x128xf32>, i32 -> vector<2x16x128xf32>
    %cst_13 = arith.constant 0.000000e+00 : f32
    %27 = vector.shape_cast %18 : vector<1x1x128xi1> to vector<1x1x128xi1>
    %28 = vector.broadcast %27 : vector<1x1x128xi1> to vector<2x16x128xi1>
    %29 = vector.broadcast %cst_13 : f32 to vector<2x16x128xf32>
    %30 = arith.select %28, %26, %29 : vector<2x16x128xi1>, vector<2x16x128xf32>
    %31 = vector.extract_strided_slice %21 {offsets = [0, 0], sizes = [1, 128], strides = [1, 1]} : vector<9x128xf32> to vector<1x128xf32>
    %32 = vector.shape_cast %31 : vector<1x128xf32> to vector<1x1x128xf32>
    %33 = vector.broadcast %32 : vector<1x1x128xf32> to vector<2x16x128xf32>
    %34 = arith.mulf %30, %33 : vector<2x16x128xf32>
    %35 = arith.addf %25, %34 : vector<2x16x128xf32>
    %36 = vector.extract_strided_slice %21 {offsets = [1, 0], sizes = [1, 128], strides = [1, 1]} : vector<9x128xf32> to vector<1x128xf32>
    %37 = vector.shape_cast %36 : vector<1x128xf32> to vector<1x1x128xf32>
    %38 = vector.broadcast %37 : vector<1x1x128xf32> to vector<2x16x128xf32>
    %39 = arith.mulf %13, %38 : vector<2x16x128xf32>
    %40 = arith.addf %35, %39 : vector<2x16x128xf32>
    %c120_i32_14 = arith.constant 120 : i32
    %41 = tpu.dynamic_rotate %13 by %c120_i32_14 dim 2 : vector<2x16x128xf32>, i32 -> vector<2x16x128xf32>
    %cst_15 = arith.constant 0.000000e+00 : f32
    %42 = vector.shape_cast %20 : vector<1x1x128xi1> to vector<1x1x128xi1>
    %43 = vector.broadcast %42 : vector<1x1x128xi1> to vector<2x16x128xi1>
    %44 = vector.broadcast %cst_15 : f32 to vector<2x16x128xf32>
    %45 = arith.select %43, %41, %44 : vector<2x16x128xi1>, vector<2x16x128xf32>
    %46 = vector.extract_strided_slice %21 {offsets = [2, 0], sizes = [1, 128], strides = [1, 1]} : vector<9x128xf32> to vector<1x128xf32>
    %47 = vector.shape_cast %46 : vector<1x128xf32> to vector<1x1x128xf32>
    %48 = vector.broadcast %47 : vector<1x1x128xf32> to vector<2x16x128xf32>
    %49 = arith.mulf %45, %48 : vector<2x16x128xf32>
    %50 = arith.addf %40, %49 : vector<2x16x128xf32>
    %c8_i32_16 = arith.constant 8 : i32
    %51 = tpu.dynamic_rotate %10 by %c8_i32_16 dim 2 : vector<2x16x128xf32>, i32 -> vector<2x16x128xf32>
    %cst_17 = arith.constant 0.000000e+00 : f32
    %52 = vector.shape_cast %18 : vector<1x1x128xi1> to vector<1x1x128xi1>
    %53 = vector.broadcast %52 : vector<1x1x128xi1> to vector<2x16x128xi1>
    %54 = vector.broadcast %cst_17 : f32 to vector<2x16x128xf32>
    %55 = arith.select %53, %51, %54 : vector<2x16x128xi1>, vector<2x16x128xf32>
    %56 = vector.extract_strided_slice %21 {offsets = [3, 0], sizes = [1, 128], strides = [1, 1]} : vector<9x128xf32> to vector<1x128xf32>
    %57 = vector.shape_cast %56 : vector<1x128xf32> to vector<1x1x128xf32>
    %58 = vector.broadcast %57 : vector<1x1x128xf32> to vector<2x16x128xf32>
    %59 = arith.mulf %55, %58 : vector<2x16x128xf32>
    %60 = arith.addf %50, %59 : vector<2x16x128xf32>
    %61 = vector.extract_strided_slice %21 {offsets = [4, 0], sizes = [1, 128], strides = [1, 1]} : vector<9x128xf32> to vector<1x128xf32>
    %62 = vector.shape_cast %61 : vector<1x128xf32> to vector<1x1x128xf32>
    %63 = vector.broadcast %62 : vector<1x1x128xf32> to vector<2x16x128xf32>
    %64 = arith.mulf %10, %63 : vector<2x16x128xf32>
    %65 = arith.addf %60, %64 : vector<2x16x128xf32>
    %c120_i32_18 = arith.constant 120 : i32
    %66 = tpu.dynamic_rotate %10 by %c120_i32_18 dim 2 : vector<2x16x128xf32>, i32 -> vector<2x16x128xf32>
    %cst_19 = arith.constant 0.000000e+00 : f32
    %67 = vector.shape_cast %20 : vector<1x1x128xi1> to vector<1x1x128xi1>
    %68 = vector.broadcast %67 : vector<1x1x128xi1> to vector<2x16x128xi1>
    %69 = vector.broadcast %cst_19 : f32 to vector<2x16x128xf32>
    %70 = arith.select %68, %66, %69 : vector<2x16x128xi1>, vector<2x16x128xf32>
    %71 = vector.extract_strided_slice %21 {offsets = [5, 0], sizes = [1, 128], strides = [1, 1]} : vector<9x128xf32> to vector<1x128xf32>
    %72 = vector.shape_cast %71 : vector<1x128xf32> to vector<1x1x128xf32>
    %73 = vector.broadcast %72 : vector<1x1x128xf32> to vector<2x16x128xf32>
    %74 = arith.mulf %70, %73 : vector<2x16x128xf32>
    %75 = arith.addf %65, %74 : vector<2x16x128xf32>
    %c8_i32_20 = arith.constant 8 : i32
    %76 = tpu.dynamic_rotate %15 by %c8_i32_20 dim 2 : vector<2x16x128xf32>, i32 -> vector<2x16x128xf32>
    %cst_21 = arith.constant 0.000000e+00 : f32
    %77 = vector.shape_cast %18 : vector<1x1x128xi1> to vector<1x1x128xi1>
    %78 = vector.broadcast %77 : vector<1x1x128xi1> to vector<2x16x128xi1>
    %79 = vector.broadcast %cst_21 : f32 to vector<2x16x128xf32>
    %80 = arith.select %78, %76, %79 : vector<2x16x128xi1>, vector<2x16x128xf32>
    %81 = vector.extract_strided_slice %21 {offsets = [6, 0], sizes = [1, 128], strides = [1, 1]} : vector<9x128xf32> to vector<1x128xf32>
    %82 = vector.shape_cast %81 : vector<1x128xf32> to vector<1x1x128xf32>
    %83 = vector.broadcast %82 : vector<1x1x128xf32> to vector<2x16x128xf32>
    %84 = arith.mulf %80, %83 : vector<2x16x128xf32>
    %85 = arith.addf %75, %84 : vector<2x16x128xf32>
    %86 = vector.extract_strided_slice %21 {offsets = [7, 0], sizes = [1, 128], strides = [1, 1]} : vector<9x128xf32> to vector<1x128xf32>
    %87 = vector.shape_cast %86 : vector<1x128xf32> to vector<1x1x128xf32>
    %88 = vector.broadcast %87 : vector<1x1x128xf32> to vector<2x16x128xf32>
    %89 = arith.mulf %15, %88 : vector<2x16x128xf32>
    %90 = arith.addf %85, %89 : vector<2x16x128xf32>
    %c120_i32_22 = arith.constant 120 : i32
    %91 = tpu.dynamic_rotate %15 by %c120_i32_22 dim 2 : vector<2x16x128xf32>, i32 -> vector<2x16x128xf32>
    %cst_23 = arith.constant 0.000000e+00 : f32
    %92 = vector.shape_cast %20 : vector<1x1x128xi1> to vector<1x1x128xi1>
    %93 = vector.broadcast %92 : vector<1x1x128xi1> to vector<2x16x128xi1>
    %94 = vector.broadcast %cst_23 : f32 to vector<2x16x128xf32>
    %95 = arith.select %93, %91, %94 : vector<2x16x128xi1>, vector<2x16x128xf32>
    %96 = vector.extract_strided_slice %21 {offsets = [8, 0], sizes = [1, 128], strides = [1, 1]} : vector<9x128xf32> to vector<1x128xf32>
    %97 = vector.shape_cast %96 : vector<1x128xf32> to vector<1x1x128xf32>
    %98 = vector.broadcast %97 : vector<1x1x128xf32> to vector<2x16x128xf32>
    %99 = arith.mulf %95, %98 : vector<2x16x128xf32>
    %100 = arith.addf %90, %99 : vector<2x16x128xf32>
    %101 = vector.shape_cast %100 : vector<2x16x128xf32> to vector<32x128xf32>
    %102 = arith.truncf %101 : vector<32x128xf32> to vector<32x128xbf16>
    %c0_24 = arith.constant 0 : index
    %c0_25 = arith.constant 0 : index
    %103 = vector.load %arg6[%c0_24, %c0_25] : memref<128x128xbf16, #tpu.memory_space<vmem>>, vector<128x128xbf16>
    %cst_26 = arith.constant dense<0.000000e+00> : vector<32x128xf32>
    %104 = tpu.matmul %102, %103, %cst_26 {dimension_numbers = #tpu.dot_dimension_numbers<[1], [0], [0], [1], [0, 0, 1, 1], [], []>} : vector<32x128xbf16>, vector<128x128xbf16>, vector<32x128xf32> -> vector<32x128xf32>
    %c0_27 = arith.constant 0 : index
    %c0_28 = arith.constant 0 : index
    %105 = vector.load %arg7[%c0_27, %c0_28] : memref<1x128xf32, #tpu.memory_space<vmem>>, vector<1x128xf32>
    %106 = vector.broadcast %105 : vector<1x128xf32> to vector<32x128xf32>
    %107 = arith.addf %104, %106 : vector<32x128xf32>
    %cst_29 = arith.constant 0.000000e+00 : f32
    %108 = vector.broadcast %cst_29 : f32 to vector<32x128xf32>
    %109 = arith.maximumf %107, %108 : vector<32x128xf32>
    %110 = vector.shape_cast %109 : vector<32x128xf32> to vector<2x16x128xf32>
    %c0_30 = arith.constant 0 : index
    %c0_31 = arith.constant 0 : index
    %c0_32 = arith.constant 0 : index
    %111 = vector.load %arg8[%c0_30, %c0_31, %c0_32] : memref<2x16x128xf32, #tpu.memory_space<vmem>>, vector<2x16x128xf32>
    tpu.vector_store %arg8[%c0_30, %c0_31, %c0_32], %110 {strides = array<i32>} : memref<2x16x128xf32, #tpu.memory_space<vmem>>, vector<2x16x128xf32>,
    return
  }
  func.func @transform_0(%arg0: i32) -> (i32, i32, i32) {
    %c0_i32 = arith.constant 0 : i32
    %c0_i32_0 = arith.constant 0 : i32
    %c0_i32_1 = arith.constant 0 : i32
    %c0_i32_2 = arith.constant 0 : i32
    return %c0_i32, %c0_i32_0, %c0_i32_1 : i32, i32, i32
  }
  func.func @transform_1(%arg0: i32) -> (i32, i32) {
    %c0_i32 = arith.constant 0 : i32
    %c0_i32_0 = arith.constant 0 : i32
    %c0_i32_1 = arith.constant 0 : i32
    return %c0_i32, %c0_i32_0 : i32, i32
  }
  func.func @transform_2(%arg0: i32) -> (i32, i32) {
    %c0_i32 = arith.constant 0 : i32
    %c0_i32_0 = arith.constant 0 : i32
    %c0_i32_1 = arith.constant 0 : i32
    return %c0_i32, %c0_i32_0 : i32, i32
  }
  func.func @transform_3(%arg0: i32) -> (i32, i32) {
    %c0_i32 = arith.constant 0 : i32
    %c0_i32_0 = arith.constant 0 : i32
    %c0_i32_1 = arith.constant 0 : i32
    return %c0_i32, %c0_i32_0 : i32, i32
  }
  func.func @transform_4(%arg0: i32) -> (i32, i32) {
    %c0_i32 = arith.constant 0 : i32
    %c0_i32_0 = arith.constant 0 : i32
    %c0_i32_1 = arith.constant 0 : i32
    return %c0_i32, %c0_i32_0 : i32, i32
  }
  func.func @transform_5(%arg0: i32) -> (i32, i32) {
    %c0_i32 = arith.constant 0 : i32
    %c0_i32_0 = arith.constant 0 : i32
    %c0_i32_1 = arith.constant 0 : i32
    return %c0_i32, %c0_i32_0 : i32, i32
  }
  func.func @transform_6(%arg0: i32) -> (i32, i32) {
    %c0_i32 = arith.constant 0 : i32
    %c0_i32_0 = arith.constant 0 : i32
    %c0_i32_1 = arith.constant 0 : i32
    return %c0_i32, %c0_i32_0 : i32, i32
  }
  func.func @transform_7(%arg0: i32) -> (i32, i32, i32) {
    %c0_i32 = arith.constant 0 : i32
    %c0_i32_0 = arith.constant 0 : i32
    %c0_i32_1 = arith.constant 0 : i32
    %c0_i32_2 = arith.constant 0 : i32
    return %c0_i32, %c0_i32_0, %c0_i32_1 : i32, i32, i32
  }
}

</mosaic_0001>

<bundles_post_ra>
// kernel: tpu_custom_call.1
= control target key start
LH: loop header
LB: loop body
LE: loop exit
PB: predicated region body
PF: predicated region fallthrough
CT: control target
= control target key end

     0   :  { %12 = vsyncpa [#allocation3], 0  ;;  %s1147_s0 = inlined_call_operand.hbm [shape: f32[2,16,128], index: 0, kind: input, shape index: {}]   ;;  %s1148_s1 = inlined_call_operand.hbm [shape: bf16[128,128], index: 1, kind: input, shape index: {}]   ;;  %s1149_s2 = inlined_call_operand.vmem [shape: f32[1,128], index: 2, kind: input, shape index: {}]   ;;  %s1150_s3 = inlined_call_operand.hbm [shape: f32[9,128], index: 3, kind: input, shape index: {}]   ;;  %s1151_s4 = inlined_call_operand.vmem [shape: f32[1,128], index: 4, kind: input, shape index: {}]   ;;  %s1152_s5 = inlined_call_operand.hbm [shape: bf16[128,128], index: 5, kind: input, shape index: {}]   ;;  %s1153_s6 = inlined_call_operand.vmem [shape: f32[1,128], index: 6, kind: input, shape index: {}]   ;;  %s1154_s7 = inlined_call_operand.hbm [shape: f32[2,16,128], index: 7, kind: output, shape index: {}]  }
   0x1   :  { %13 = vsyncpa [#allocation6], 0 }
   0x2   :  { %14 = vsyncpa [#allocation9], 0 }
   0x3   :  { %15 = vsyncpa [#allocation4], 0  ;;  %s813_s24 = smov [#allocation5]   ;;  %s695_s28 = scalar_lea.hbm %s1148_s1, 1024 }
   0x4   :  { %s33_s25 = sshll.u32 %s813_s24, 4  ;;  %p696_p0 = scmp.ne.s32.totalorder %s1148_s1, %s695_s28  ;;  %s34_s25 = int_to_ptr.vmem [resolvable:$true] %s33_s25 }
   0x5   :  { %p699_p1 = scmp.lt.u32.totalorder %s695_s28, %s1148_s1 }
   0x7   :  { %p701_p2 = pnand %p699_p1, %p696_p0 }
   0x9   :  { %704 = shalt.err (!%p701_p2)
}
   0xa   :  { %s705_s10 = scalar_lea.vmem %s34_s25, 1024  ;;  %p710_p4 = scmp.lt.s32.totalorder %s34_s25, %s34_s25 }
   0xb   :  { %p706_p3 = scmp.ne.s32.totalorder %s34_s25, %s705_s10  ;;  %p711_p5 = scmp.lt.s32.totalorder %s705_s10, %s705_s10 }
   0xd   :  { %p712_p6 = por %p711_p5, %p710_p4 }
   0xf   :  { %p713_p7 = pnand %p712_p6, %p706_p3 }
  0x11   :  { %716 = shalt.err (!%p713_p7)
}
  0x12   :  { %s814_s11 = smov 64   ;;  %s815_s12 = smov 4  }
  0x13   :  { %39 = dma.hbm_to_vmem [thread:$0]  %s1148_s1, 1024, %s34_s25, [#allocation6], %s814_s11, %s814_s11, %s815_s12  }
  0x14   :  { %s816_s15 = smov [#allocation2]   ;;  %s717_s19 = scalar_lea.hbm %s1147_s0, 512 }
  0x15   :  { %s21_s16 = sshll.u32 %s816_s15, 4  ;;  %p718_p8 = scmp.ne.s32.totalorder %s1147_s0, %s717_s19  ;;  %s22_s16 = int_to_ptr.vmem [resolvable:$true] %s21_s16 }
  0x16   :  { %p721_p9 = scmp.lt.u32.totalorder %s717_s19, %s1147_s0 }
  0x18   :  { %p723_p10 = pnand %p721_p9, %p718_p8 }
  0x1a   :  { %726 = shalt.err (!%p723_p10)
}
  0x1b   :  { %s727_s24 = scalar_lea.vmem %s22_s16, 512  ;;  %p732_p12 = scmp.lt.s32.totalorder %s22_s16, %s22_s16 }
  0x1c   :  { %p728_p11 = scmp.ne.s32.totalorder %s22_s16, %s727_s24  ;;  %p733_p13 = scmp.lt.s32.totalorder %s727_s24, %s727_s24 }
  0x1e   :  { %p734_p0 = por %p733_p13, %p732_p12 }
  0x20   :  { %p735_p1 = pnand %p734_p0, %p728_p11 }
  0x22   :  { %738 = shalt.err (!%p735_p1)
}
  0x23   :  { %s817_s1 = smov 128   ;;  %s818_s25 = smov 8  }
  0x24   :  { %27 = dma.hbm_to_vmem [thread:$0]  %s1147_s0, 512, %s22_s16, [#allocation3], %s817_s1, %s817_s1, %s818_s25  }
  0x25   :  { %s819_s28 = smov [#allocation7]   ;;  %s820_s30 = smov [#allocation8]  }
  0x26   :  { %s47_s29 = sshll.u32 %s819_s28, 4  ;;  %s61_s8 = sshll.u32 %s820_s30, 4  ;;  %s48_s29 = int_to_ptr.vmem [resolvable:$true] %s47_s29  ;;  %s893_s8 = int_to_ptr.vmem [resolvable:$true] %s61_s8 }
  0x27   :  { %s739_s13 = scalar_lea.hbm %s1150_s3, 256 }
  0x28   :  { %p740_p2 = scmp.ne.s32.totalorder %s1150_s3, %s739_s13  ;;  %p743_p3 = scmp.lt.u32.totalorder %s739_s13, %s1150_s3 }
  0x2a   :  { %p745_p4 = pnand %p743_p3, %p740_p2 }
  0x2c   :  { %748 = shalt.err (!%p745_p4)
}
  0x2d   :  { %s749_s0 = scalar_lea.vmem %s48_s29, 256  ;;  %p754_p6 = scmp.lt.s32.totalorder %s48_s29, %s48_s29 }
  0x2e   :  { %p750_p5 = scmp.ne.s32.totalorder %s48_s29, %s749_s0  ;;  %p755_p7 = scmp.lt.s32.totalorder %s749_s0, %s749_s0 }
  0x30   :  { %p756_p8 = por %p755_p7, %p754_p6 }
  0x32   :  { %p757_p9 = pnand %p756_p8, %p750_p5 }
  0x34   :  { %760 = shalt.err (!%p757_p9)
}
  0x35   :  { %53 = dma.hbm_to_vmem [thread:$0]  %s1150_s3, 256, %s48_s29, [#allocation6], %s817_s1, %s817_s1, %s818_s25  }
  0x36   :  { %s761_s22 = scalar_lea.hbm %s1152_s5, 1024 }
  0x37   :  { %p762_p10 = scmp.ne.s32.totalorder %s1152_s5, %s761_s22  ;;  %p765_p11 = scmp.lt.u32.totalorder %s761_s22, %s1152_s5 }
  0x39   :  { %p767_p12 = pnand %p765_p11, %p762_p10 }
  0x3b   :  { %770 = shalt.err (!%p767_p12)
}
  0x3c   :  { %s771_s28 = scalar_lea.vmem %s893_s8, 1024  ;;  %p776_p0 = scmp.lt.s32.totalorder %s893_s8, %s893_s8 }
  0x3d   :  { %p772_p13 = scmp.ne.s32.totalorder %s893_s8, %s771_s28  ;;  %p777_p1 = scmp.lt.s32.totalorder %s771_s28, %s771_s28 }
  0x3f   :  { %p778_p2 = por %p777_p1, %p776_p0 }
  0x41   :  { %p779_p3 = pnand %p778_p2, %p772_p13 }
  0x43   :  { %782 = shalt.err (!%p779_p3)
}
  0x44   :  { %67 = dma.hbm_to_vmem [thread:$0]  %s1152_s5, 1024, %s893_s8, [#allocation9], %s814_s11, %s814_s11, %s815_s12  }
  0x45   :  { %805 = dma.done.wait [#allocation3], 512  }
  0x46   :  { %806 = vsyncadd [#allocation3], 4294966784 }
  0x47   :  { %807 = dma.done.wait [#allocation6], 1280  }
  0x48   :  { %808 = vsyncadd [#allocation6], 4294966016 }
  0x49   :  { %809 = dma.done.wait [#allocation9], 1024  }
  0x4a   :  { %810 = vsyncadd [#allocation9], 4294966272  ;;  %v679_v0 = vld [vmem:[#allocation5] sm:$0xff]   ;;  %v680_v1 = vld [vmem:[#allocation5 + $0x8] sm:$0xff]   ;;  %vm230_vm0 = vcmask 1046528   ;;  %vm217_vm1 = vcmask 1040384   ;;  %v243_v51 = vlaneseq }
  0x4b   :  { %629 = vmatprep.subr.bf16.mxu0 %v679_v0  ;;  %v681_v2 = vld [vmem:[#allocation5 + $0x10] sm:$0xff]   ;;  %v682_v3 = vld [vmem:[#allocation5 + $0x18] sm:$0xff]   ;;  %v83_v4 = vld [vmem:[#allocation2] sm:$0xff]  ;;  %s822_s9 = smov [#allocation10]  }
  0x4c   :  { %630 = vmatpush3.bf16.msra.mxu0 %v679_v0  ;;  %v84_v5 = vld [vmem:[#allocation2 + $0x8] sm:$0xff]  ;;  %v683_v7 = vld [vmem:[#allocation5 + $0x20] sm:$0xff]   ;;  %v685_v9 = vld [vmem:[#allocation5 + $0x30] sm:$0xff]   ;;  %v1021_v52 = vshrl.u32 %v243_v51, 7  ;;  %v1024_v55 = vand.u32 127, %v243_v51  ;;  %s575_s10 = sshll.u32 %s822_s9, 4  ;;  %s576_s10 = int_to_ptr.vmem [resolvable:$true] %s575_s10 }
  0x4d   :  { %631 = vmatprep.subr.bf16.mxu0 %v680_v1  ;;  %v87_v6 = vpack.c.bf16 %v84_v5, %v83_v4  ;;  %v684_v8 = vld [vmem:[#allocation5 + $0x28] sm:$0xff]   ;;  %v686_v10 = vld [vmem:[#allocation5 + $0x38] sm:$0xff]   ;;  %v85_v11 = vld [vmem:[#allocation2 + $0x10] sm:$0xff]  ;;  %p788_p5 = scmp.lt.s32.totalorder %s576_s10, %s576_s10 }
  0x4e   :  { %v86_v12 = vld [vmem:[#allocation2 + $0x18] sm:$0xff]  ;;  %v589_v14 = vld [vmem:[%s1149_s2] ss:$0 sm:$0xff]  ;;  %v687_v40 = vld [vmem:[#allocation8] sm:$0xff]   ;;  %s821_s2 = smov 120   ;;  %v272_v54 = vsub.s32 0, %v1021_v52 }
  0x4f   :  { %645 = vmatprep.mubr.bf16.mxu0 %v87_v6  ;;  %v88_v13 = vpack.c.bf16 %v86_v12, %v85_v11  ;;  %649 = vmatprep.subr.bf16.mxu1 %v687_v40  ;;  %v688_v41 = vld [vmem:[#allocation8 + $0x8] sm:$0xff]   ;;  %v689_v43 = vld [vmem:[#allocation8 + $0x10] sm:$0xff]   ;;  %v690_v44 = vld [vmem:[#allocation8 + $0x18] sm:$0xff]   ;;  %v284_v58 = vsub.s32 1, %v1021_v52  ;;  %vm245_vm2 = vcmp.ge.s32.totalorder %v1024_v55, 8  ;;  %v310_v62 = vsub.s32 2, %v1021_v52 }
  0x50   :  { %632 = vmatpush3.bf16.msra.mxu0 %v680_v1  ;;  %650 = vmatpush3.bf16.msra.mxu1 %v687_v40  ;;  %v691_v45 = vld [vmem:[#allocation8 + $0x20] sm:$0xff]   ;;  %v692_v46 = vld [vmem:[#allocation8 + $0x28] sm:$0xff]   ;;  %v693_v48 = vld [vmem:[#allocation8 + $0x30] sm:$0xff]   ;;  %vm246_vm3 = vcmp.lt.s32.totalorder %v1024_v55, 120 }
  0x51   :  { %633 = vmatprep.subr.bf16.mxu0 %v681_v2  ;;  %651 = vmatprep.subr.bf16.mxu1 %v688_v41  ;;  %v694_v49 = vld [vmem:[#allocation8 + $0x38] sm:$0xff]   ;;  %v1026_v57 = vld [vmem:[#allocation7] sm:$0xff] }
  0x52   :  { %v273_v60 = vrot.slane %v1026_v57, %v272_v54  ;;  %v598_v63 = vld [vmem:[%s1151_s4] ss:$0 sm:$0xff]  ;;  %v285_v1 = vrot.slane %v1026_v57, %v284_v58 }
  0x54   :  { %634 = vmatpush3.bf16.msra.mxu0 %v681_v2  ;;  %652 = vmatpush3.bf16.msra.mxu1 %v688_v41  ;;  %v334_v2 = vsub.s32 3, %v1021_v52 }
  0x55   :  { %635 = vmatprep.subr.bf16.mxu0 %v682_v3  ;;  %653 = vmatprep.subr.bf16.mxu1 %v689_v43 }
  0x58   :  { %636 = vmatpush3.bf16.msra.mxu0 %v682_v3  ;;  %654 = vmatpush3.bf16.msra.mxu1 %v689_v43 }
  0x59   :  { %637 = vmatprep.subr.bf16.mxu0 %v683_v7  ;;  %655 = vmatprep.subr.bf16.mxu1 %v690_v44 }
  0x5c   :  { %638 = vmatpush3.bf16.msra.mxu0 %v683_v7  ;;  %656 = vmatpush3.bf16.msra.mxu1 %v690_v44  ;;  %v1042_v7 = vrot.slane %v1026_v57, %v310_v62 }
  0x5d   :  { %639 = vmatprep.subr.bf16.mxu0 %v684_v8  ;;  %657 = vmatprep.subr.bf16.mxu1 %v691_v45 }
  0x60   :  { %640 = vmatpush3.bf16.msra.mxu0 %v684_v8  ;;  %658 = vmatpush3.bf16.msra.mxu1 %v691_v45  ;;  %v346_v8 = vsub.s32 4, %v1021_v52 }
  0x61   :  { %641 = vmatprep.subr.bf16.mxu0 %v685_v9  ;;  %659 = vmatprep.subr.bf16.mxu1 %v692_v46 }
  0x64   :  { %642 = vmatpush3.bf16.msra.mxu0 %v685_v9  ;;  %660 = vmatpush3.bf16.msra.mxu1 %v692_v46 }
  0x65   :  { %643 = vmatprep.subr.bf16.mxu0 %v686_v10  ;;  %661 = vmatprep.subr.bf16.mxu1 %v693_v48 }
  0x68   :  { %644 = vmatpush3.bf16.msra.mxu0 %v686_v10  ;;  %662 = vmatpush3.bf16.msra.mxu1 %v693_v48  ;;  %v1047_v10 = vrot.slane %v1026_v57, %v334_v2  ;;  %v370_v48 = vsub.s32 5, %v1021_v52 }
  0x69   :  { %663 = vmatprep.subr.bf16.mxu1 %v694_v49 }
  0x6b   :  { %646 = vmatmul.mubr.bf16.vlgmr.msra.gmra.mrb[0].mxu0 %v88_v13 }
  0x6c   :  { %664 = vmatpush3.bf16.msra.mxu1 %v694_v49 }
 0x13e   :  { %v647_v15 = vpop.f32.mrb[0].mxu0 }
 0x13f   :  { %v203_v16 = vadd.f32 %v647_v15, %v589_v14  ;;  %v194_v17 = vpop.f32.mrb[1].mxu0 }
 0x140   :  { %v195_v18 = vadd.f32 %v589_v14, %v194_v17  ;;  %v648_v19 = vpop.f32.mrb[2].mxu0  ;;  %v1056_v17 = vrot.slane %v1026_v57, %v346_v8  ;;  %v406_v8 = vsub.s32 7, %v1021_v52 }
 0x141   :  { %v933_v20 = vmax.f32 %v203_v16, 0.0  ;;  %v206_v21 = vadd.f32 %v648_v19, %v589_v14  ;;  %v197_v22 = vpop.f32.mrb[3].mxu0 }
 0x142   :  { %v935_v23 = vmax.f32 %v195_v18, 0.0  ;;  %v198_v24 = vadd.f32 %v589_v14, %v197_v22 }
 0x143   :  { %v937_v25 = vmax.f32 %v206_v21, 0.0  ;;  %324 = vrot.lane.b32.xlu0 %v933_v20, %s818_s25  ;;  %v221_v27 = vrot.slane %v933_v20, 7  ;;  %v234_v29 = vrot.slane %v933_v20, 1 }
 0x144   :  { %v941_v26 = vmax.f32 %v198_v24, 0.0  ;;  %v218_v31 = vrot.slane %v935_v23, 7  ;;  %v231_v36 = vrot.slane %v935_v23, 1 }
 0x145   :  { %326 = vrot.lane.b32.xlu1 %v937_v25, %s818_s25  ;;  %v222_v28 = vrot.slane %v937_v25, 7  ;;  %v235_v30 = vrot.slane %v937_v25, 1  ;;  %v962_v37 = vsel %vm217_vm1, 0.0, %v221_v27 }
 0x146   :  { %v219_v32 = vrot.slane %v941_v26, 7  ;;  %v232_v33 = vrot.slane %v941_v26, 1  ;;  %v981_v42 = vsel %vm217_vm1, 0.0, %v218_v31  ;;  %v288_v9 = vmul.f32 %v285_v1, %v962_v37 }
 0x147   :  { %320 = vrot.lane.b32.xlu0 %v935_v23, %s818_s25  ;;  %v955_v34 = vsel %vm217_vm1, %v221_v27, %v222_v28  ;;  %v958_v35 = vsel %vm230_vm0, %v234_v29, %v235_v30  ;;  %v1002_v47 = vsel %vm230_vm0, %v235_v30, 0.0  ;;  %v350_v29 = vmul.f32 %v1056_v17, %v933_v20 }
 0x148   :  { %v965_v38 = vsel %vm217_vm1, %v218_v31, %v219_v32  ;;  %v970_v39 = vsel %vm230_vm0, %v231_v36, %v232_v33  ;;  %v1009_v50 = vsel %vm230_vm0, %v232_v33, 0.0  ;;  %v286_v31 = vmul.f32 %v285_v1, %v981_v42 }
 0x149   :  { %260 = vrot.lane.b32.xlu1 %v962_v37, %s818_s25  ;;  %v289_v43 = vmul.f32 %v285_v1, %v955_v34 }
 0x14b   :  { %356 = vrot.lane.b32.xlu0 %v935_v23, %s821_s2 }
 0x14d   :  { %322 = vrot.lane.b32.xlu1 %v941_v26, %s818_s25 }
 0x14f   :  { %298 = vrot.lane.b32.xlu0 %v962_v37, %s821_s2 }
 0x151   :  { %358 = vrot.lane.b32.xlu1 %v941_v26, %s821_s2 }
 0x153   :  { %256 = vrot.lane.b32.xlu0 %v981_v42, %s818_s25 }
 0x155   :  { %262 = vrot.lane.b32.xlu1 %v955_v34, %s818_s25 }
 0x157   :  { %294 = vrot.lane.b32.xlu0 %v981_v42, %s821_s2 }
 0x159   :  { %300 = vrot.lane.b32.xlu1 %v955_v34, %s821_s2 }
 0x15b   :  { %258 = vrot.lane.b32.xlu0 %v965_v38, %s818_s25 }
 0x15d   :  { %362 = vrot.lane.b32.xlu1 %v937_v25, %s821_s2 }
 0x15f   :  { %360 = vrot.lane.b32.xlu0 %v933_v20, %s821_s2 }
 0x161   :  { %296 = vrot.lane.b32.xlu1 %v965_v38, %s821_s2 }
 0x163   :  { %384 = vrot.lane.b32.xlu0 %v958_v35, %s818_s25 }
 0x165   :  { %386 = vrot.lane.b32.xlu1 %v1002_v47, %s818_s25 }
 0x167   :  { %380 = vrot.lane.b32.xlu0 %v970_v39, %s818_s25 }
 0x169   :  { %382 = vrot.lane.b32.xlu1 %v1009_v50, %s818_s25 }
 0x16b   :  { %416 = vrot.lane.b32.xlu0 %v970_v39, %s821_s2 }
 0x16d   :  { %418 = vrot.lane.b32.xlu1 %v1009_v50, %s821_s2 }
 0x16f   :  { %420 = vrot.lane.b32.xlu0 %v958_v35, %s821_s2 }
 0x171   :  { %422 = vrot.lane.b32.xlu1 %v1002_v47, %s821_s2 }
 0x1b5   :  { %v325_v53 = vpop.permute.xlu0 %324 }
 0x1b6   :  { %v330_v12 = vsel %vm245_vm2, %v325_v53, 0.0 }
 0x1b7   :  { %v327_v56 = vpop.permute.xlu1 %326  ;;  %v338_v18 = vmul.f32 %v1047_v10, %v330_v12 }
 0x1b8   :  { %v331_v42 = vsel %vm245_vm2, %v327_v56, 0.0  ;;  %v348_v56 = vmul.f32 %v1056_v17, %v935_v23 }
 0x1b9   :  { %v321_v59 = vpop.permute.xlu0 %320  ;;  %v339_v62 = vmul.f32 %v1047_v10, %v331_v42 }
 0x1ba   :  { %v328_v40 = vsel %vm245_vm2, %v321_v59, 0.0 }
 0x1bb   :  { %v261_v61 = vpop.permute.xlu1 %260  ;;  %v336_v51 = vmul.f32 %v1047_v10, %v328_v40 }
 0x1bc   :  { %v268_v0 = vsel %vm245_vm2, %v261_v61, 0.0  ;;  %v394_v61 = vsub.s32 6, %v1021_v52 }
 0x1bd   :  { %v276_v3 = vmul.f32 %v273_v60, %v268_v0  ;;  %v1039_v4 = vpop.permute.xlu0 %356 }
 0x1bf   :  { %v280_v5 = vadd.f32 %v598_v63, %v276_v3  ;;  %v323_v6 = vpop.permute.xlu1 %322 }
 0x1c1   :  { %v299_v11 = vpop.permute.xlu0 %298  ;;  %v292_v14 = vadd.f32 %v288_v9, %v280_v5  ;;  %v371_v9 = vrot.slane %v1026_v57, %v370_v48 }
 0x1c2   :  { %v306_v13 = vsel %vm246_vm3, %v299_v11, 0.0 }
 0x1c3   :  { %v314_v15 = vmul.f32 %v1042_v7, %v306_v13  ;;  %v359_v16 = vpop.permute.xlu1 %358  ;;  %v351_v13 = vmul.f32 %v1056_v17, %v937_v25 }
 0x1c5   :  { %v318_v19 = vadd.f32 %v314_v15, %v292_v14  ;;  %v257_v21 = vpop.permute.xlu0 %256 }
 0x1c6   :  { %v266_v22 = vsel %vm245_vm2, %v257_v21, 0.0 }
 0x1c7   :  { %v342_v24 = vadd.f32 %v338_v18, %v318_v19  ;;  %v274_v27 = vmul.f32 %v273_v60, %v266_v22  ;;  %v263_v28 = vpop.permute.xlu1 %262  ;;  %v287_v18 = vmul.f32 %v285_v1, %v965_v38  ;;  %v395_v22 = vrot.slane %v1026_v57, %v394_v61 }
 0x1c8   :  { %v269_v30 = vsel %vm245_vm2, %v263_v28, 0.0  ;;  %v364_v38 = vsel %vm246_vm3, %v1039_v4, 0.0 }
 0x1c9   :  { %v278_v32 = vadd.f32 %v598_v63, %v274_v27  ;;  %v277_v33 = vmul.f32 %v273_v60, %v269_v30  ;;  %v295_v36 = vpop.permute.xlu0 %294  ;;  %v354_v37 = vadd.f32 %v350_v29, %v342_v24  ;;  %v365_v29 = vsel %vm246_vm3, %v359_v16, 0.0 }
 0x1ca   :  { %v304_v41 = vsel %vm246_vm3, %v295_v36, 0.0  ;;  %v372_v4 = vmul.f32 %v371_v9, %v364_v38 }
 0x1cb   :  { %v281_v44 = vadd.f32 %v598_v63, %v277_v33  ;;  %v290_v45 = vadd.f32 %v286_v31, %v278_v32  ;;  %v312_v20 = vmul.f32 %v1042_v7, %v304_v41  ;;  %v301_v46 = vpop.permute.xlu1 %300 }
 0x1cc   :  { %v307_v49 = vsel %vm246_vm3, %v301_v46, 0.0 }
 0x1cd   :  { %v316_v53 = vadd.f32 %v312_v20, %v290_v45  ;;  %v293_v54 = vadd.f32 %v289_v43, %v281_v44  ;;  %v315_v58 = vmul.f32 %v1042_v7, %v307_v49  ;;  %v259_v34 = vpop.permute.xlu0 %258 }
 0x1ce   :  { %v267_v59 = vsel %vm245_vm2, %v259_v34, 0.0 }
 0x1cf   :  { %v340_v0 = vadd.f32 %v336_v51, %v316_v53  ;;  %v319_v2 = vadd.f32 %v315_v58, %v293_v54  ;;  %v275_v3 = vmul.f32 %v273_v60, %v267_v59  ;;  %v363_v5 = vpop.permute.xlu1 %362  ;;  %v329_v60 = vsel %vm245_vm2, %v323_v6, 0.0 }
 0x1d0   :  { %v367_v25 = vsel %vm246_vm3, %v363_v5, 0.0  ;;  %v337_v28 = vmul.f32 %v1047_v10, %v329_v60  ;;  %v349_v10 = vmul.f32 %v1056_v17, %v941_v26  ;;  %v599_v17 = vld [vmem:[#allocation7 + $0x8] ss:$0 sm:$0xff] }
 0x1d1   :  { %v343_v11 = vadd.f32 %v339_v62, %v319_v2  ;;  %v279_v12 = vadd.f32 %v598_v63, %v275_v3  ;;  %v361_v14 = vpop.permute.xlu0 %360  ;;  %v352_v15 = vadd.f32 %v348_v56, %v340_v0  ;;  %v407_v63 = vrot.slane %v1026_v57, %v406_v8 }
 0x1d2   :  { %v366_v23 = vsel %vm246_vm3, %v361_v14, 0.0  ;;  %v375_v30 = vmul.f32 %v371_v9, %v367_v25 }
 0x1d3   :  { %v355_v19 = vadd.f32 %v351_v13, %v343_v11  ;;  %v374_v21 = vmul.f32 %v371_v9, %v366_v23  ;;  %v297_v52 = vpop.permute.xlu1 %296  ;;  %v291_v1 = vadd.f32 %v287_v18, %v279_v12  ;;  %v410_v40 = vmul.f32 %v407_v63, %v958_v35 }
 0x1d4   :  { %v305_v24 = vsel %vm246_vm3, %v297_v52, 0.0  ;;  %v411_v20 = vmul.f32 %v407_v63, %v1002_v47  ;;  %v376_v46 = vadd.f32 %v372_v4, %v352_v15  ;;  %v408_v54 = vmul.f32 %v407_v63, %v970_v39 }
 0x1d5   :  { %v313_v6 = vmul.f32 %v1042_v7, %v305_v24  ;;  %v385_v27 = vpop.permute.xlu0 %384  ;;  %v378_v31 = vadd.f32 %v374_v21, %v354_v37  ;;  %v379_v41 = vadd.f32 %v375_v30, %v355_v19  ;;  %v373_v37 = vmul.f32 %v371_v9, %v365_v29 }
 0x1d6   :  { %v390_v57 = vsel %vm245_vm2, %v385_v27, 0.0  ;;  %v409_v62 = vmul.f32 %v407_v63, %v1009_v50 }
 0x1d7   :  { %v317_v32 = vadd.f32 %v313_v6, %v291_v1  ;;  %v398_v33 = vmul.f32 %v395_v22, %v390_v57  ;;  %v387_v36 = vpop.permute.xlu1 %386 }
 0x1d8   :  { %v391_v7 = vsel %vm245_vm2, %v387_v36, 0.0 }
 0x1d9   :  { %v341_v43 = vadd.f32 %v337_v28, %v317_v32  ;;  %v402_v16 = vadd.f32 %v398_v33, %v378_v31  ;;  %v399_v44 = vmul.f32 %v395_v22, %v391_v7  ;;  %v381_v45 = vpop.permute.xlu0 %380 }
 0x1da   :  { %v388_v42 = vsel %vm245_vm2, %v381_v45, 0.0 }
 0x1db   :  { %v403_v35 = vadd.f32 %v399_v44, %v379_v41  ;;  %v396_v48 = vmul.f32 %v395_v22, %v388_v42  ;;  %v383_v49 = vpop.permute.xlu1 %382  ;;  %v353_v51 = vadd.f32 %v349_v10, %v341_v43  ;;  %v414_v53 = vadd.f32 %v410_v40, %v402_v16 }
 0x1dc   :  { %v389_v26 = vsel %vm245_vm2, %v383_v49, 0.0 }
 0x1dd   :  { %v400_v58 = vadd.f32 %v396_v48, %v376_v46  ;;  %v377_v34 = vadd.f32 %v373_v37, %v353_v51  ;;  %v397_v59 = vmul.f32 %v395_v22, %v389_v26  ;;  %v417_v47 = vpop.permute.xlu0 %416  ;;  %v415_v61 = vadd.f32 %v411_v20, %v403_v35  ;;  %v600_v22 = vld [vmem:[%s1153_s6] ss:$0 sm:$0xff]  ;;  %s783_s6 = scalar_lea.vmem %s576_s10, 512 }
 0x1de   :  { %v424_v56 = vsel %vm246_vm3, %v417_v47, 0.0  ;;  %p784_p4 = scmp.ne.s32.totalorder %s576_s10, %s783_s6  ;;  %p789_p6 = scmp.lt.s32.totalorder %s783_s6, %s783_s6 }
 0x1df   :  { %v401_v0 = vadd.f32 %v397_v59, %v377_v34  ;;  %v432_v2 = vmul.f32 %v599_v17, %v424_v56  ;;  %v419_v3 = vpop.permute.xlu1 %418  ;;  %v412_v5 = vadd.f32 %v408_v54, %v400_v58 }
 0x1e0   :  { %v425_v39 = vsel %vm246_vm3, %v419_v3, 0.0  ;;  %p790_p7 = por %p789_p6, %p788_p5 }
 0x1e1   :  { %v433_v8 = vmul.f32 %v599_v17, %v425_v39  ;;  %v421_v9 = vpop.permute.xlu0 %420  ;;  %v413_v11 = vadd.f32 %v409_v62, %v401_v0  ;;  %v436_v15 = vadd.f32 %v432_v2, %v412_v5 }
 0x1e2   :  { %v426_v12 = vsel %vm246_vm3, %v421_v9, 0.0  ;;  %p791_p8 = pnand %p790_p7, %p784_p4 }
 0x1e3   :  { %v434_v13 = vmul.f32 %v599_v17, %v426_v12  ;;  %v423_v14 = vpop.permute.xlu1 %422  ;;  %v437_v18 = vadd.f32 %v433_v8, %v413_v11 }
 0x1e4   :  { %v427_v50 = vsel %vm246_vm3, %v423_v14, 0.0 }
 0x1e5   :  { %v435_v23 = vmul.f32 %v599_v17, %v427_v50  ;;  %v440_v60 = vpack.c.bf16 %v437_v18, %v436_v15  ;;  %v438_v19 = vadd.f32 %v434_v13, %v414_v53 }
 0x1e7   :  { %v439_v21 = vadd.f32 %v435_v23, %v415_v61  ;;  %665 = vmatprep.mubr.bf16.mxu1 %v440_v60 }
 0x1e9   :  { %v441_v52 = vpack.c.bf16 %v439_v21, %v438_v19 }
 0x1eb   :  { %666 = vmatmul.mubr.bf16.vlgmr.msra.gmra.mrb[0].mxu1 %v441_v52 }
 0x2be   :  { %v667_v63 = vpop.f32.mrb[0].mxu1 }
 0x2bf   :  { %v556_v25 = vadd.f32 %v667_v63, %v600_v22  ;;  %v547_v24 = vpop.f32.mrb[1].mxu1 }
 0x2c0   :  { %v548_v38 = vadd.f32 %v600_v22, %v547_v24  ;;  %v668_v1 = vpop.f32.mrb[2].mxu1 }
 0x2c1   :  { %v564_v6 = vmax.f32 %v556_v25, 0.0  ;;  %v559_v27 = vadd.f32 %v668_v1, %v600_v22  ;;  %v550_v55 = vpop.f32.mrb[3].mxu1 }
 0x2c2   :  { %v562_v28 = vmax.f32 %v548_v38, 0.0  ;;  %v551_v29 = vadd.f32 %v600_v22, %v550_v55 }
 0x2c3   :  { %568 = vst [vmem:[#allocation10 + $0x10] sm:$0xff] %v564_v6  ;;  %v565_v57 = vmax.f32 %v559_v27, 0.0 }
 0x2c4   :  { %566 = vst [vmem:[#allocation10] sm:$0xff] %v562_v28  ;;  %v563_v30 = vmax.f32 %v551_v29, 0.0 }
 0x2c5   :  { %569 = vst [vmem:[#allocation10 + $0x18] sm:$0xff] %v565_v57 }
 0x2c6   :  { %567 = vst [vmem:[#allocation10 + $0x8] sm:$0xff] %v563_v30 }
 0x2c7   :  { %794 = shalt.err (!%p791_p8)
}
 0x2c8   :  { %s795_s15 = scalar_lea.hbm %s1154_s7, 512 }
 0x2c9   :  { %p796_p9 = scmp.ne.s32.totalorder %s1154_s7, %s795_s15  ;;  %p799_p10 = scmp.lt.u32.totalorder %s795_s15, %s1154_s7 }
 0x2cb   :  { %p801_p11 = pnand %p799_p10, %p796_p9 }
 0x2cd   :  { %804 = shalt.err (!%p801_p11)
}
 0x2ce   :  { %581 = dma.vmem_to_hbm [thread:$0]  %s576_s10, 512, %s1154_s7, [#allocation4], %s817_s1, %s817_s1, %s818_s25  }
 0x2cf   :  { %811 = dma.done.wait [#allocation4], 512  }
 0x2d0   :  { %812 = vsyncadd [#allocation4], 4294966784 }
 0x2d1   :  { %585 = vsyncpa [#allocation3], 1 }
 0x2d2   :  { %586 = vsyncpa [#allocation6], 1 }
 0x2d3   :  { %587 = vsyncpa [#allocation9], 1 }
 0x2d4   :  { %588 = vsyncpa [#allocation4], 1 }

</bundles_post_ra>
